<compile_context>
chip_gen: v6e
topology: v6e:2x2x1
jax: 0.10.0
libtpu: 0.0.40
codegen_flags: <defaults>
</compile_context>

<pallas_src>
import jax
import jax.numpy as jnp
from jax.experimental import pallas as pl
from jax.experimental.pallas import tpu as pltpu

_VMEM_BUDGET = 8 * 1024 * 1024  # per-step working set (x2 for double buffering)


def _concat_flat_kernel(x_ref, y_ref, o_ref):
    # Blocks: x (nb, D1), y (nb, D2), o (nb, D1+D2). D1 is 128-aligned on this
    # path, so both stores are full unmasked lane-dense writes.
    d1 = x_ref.shape[1]
    o_ref[:, :d1] = x_ref[...]
    o_ref[:, d1:] = y_ref[...]


def _concat_chw_kernel(x_ref, y_ref, o_ref):
    # Blocks: x (1, C1, hw), y (1, C2, hw), o (1, C1+C2, hw). Lane axis = hw.
    c1 = x_ref.shape[1]
    o_ref[:, :c1, :] = x_ref[...]
    o_ref[:, c1:, :] = y_ref[...]


def concate(x, y):
    """torch.cat((x, y), dim=1) for NCHW tensors (PyTorch Concate.forward)."""
    assert x.ndim == 4 and y.ndim == 4
    N, C1, H, W = x.shape
    Ny, C2, Hy, Wy = y.shape
    assert (N, H, W) == (Ny, Hy, Wy), "non-channel dims must match"
    assert x.dtype == y.dtype

    HW = H * W
    D1, D2 = C1 * HW, C2 * HW
    itemsize = jnp.dtype(x.dtype).itemsize

    # Bytes touched per batch row per step: x row + y row + out row.
    row_bytes = 2 * (D1 + D2) * itemsize
    n_fit = _VMEM_BUDGET // max(row_bytes, 1)

    # Fully-flat path: lane-dense and the channel-split offset D1 is a multiple
    # of 128, so there are no masked boundary stores. Requires a legal batch
    # block (multiple of 8 or the full N) that fits the VMEM budget.
    use_flat = (D1 % 128 == 0) and (n_fit >= N or n_fit >= 8)

    if use_flat:
        n_blk = N if n_fit >= N else (n_fit // 8) * 8
        grid = (pl.cdiv(N, n_blk),)
        out = pl.pallas_call(
            _concat_flat_kernel,
            out_shape=jax.ShapeDtypeStruct((N, D1 + D2), x.dtype),
            grid=grid,
            in_specs=[
                pl.BlockSpec((n_blk, D1), lambda i: (i, 0)),
                pl.BlockSpec((n_blk, D2), lambda i: (i, 0)),
            ],
            out_specs=pl.BlockSpec((n_blk, D1 + D2), lambda i: (i, 0)),
            compiler_params=pltpu.CompilerParams(
                dimension_semantics=("parallel",)),
        )(x.reshape(N, D1), y.reshape(N, D2))
    else:
        # Fallback: channels on sublanes, flattened spatial extent on lanes,
        # tiled in 128-aligned chunks when it does not fit the budget whole.
        max_hw = _VMEM_BUDGET // max(2 * (C1 + C2) * itemsize, 1)
        if HW <= max_hw:
            hw_blk = HW  # full extent -> always a legal lane block
        else:
            hw_blk = max(128, (max_hw // 128) * 128)
        grid = (N, pl.cdiv(HW, hw_blk))
        out = pl.pallas_call(
            _concat_chw_kernel,
            out_shape=jax.ShapeDtypeStruct((N, C1 + C2, HW), x.dtype),
            grid=grid,
            in_specs=[
                pl.BlockSpec((1, C1, hw_blk), lambda n, h: (n, 0, h)),
                pl.BlockSpec((1, C2, hw_blk), lambda n, h: (n, 0, h)),
            ],
            out_specs=pl.BlockSpec((1, C1 + C2, hw_blk),
                                   lambda n, h: (n, 0, h)),
            compiler_params=pltpu.CompilerParams(
                dimension_semantics=("parallel", "parallel")),
        )(x.reshape(N, C1, HW), y.reshape(N, C2, HW))

    # Reshape of trailing contiguous dims is free metadata.
    return out.reshape(N, C1 + C2, H, W)


if __name__ == "__main__":
    key = jax.random.PRNGKey(0)
    kx, ky = jax.random.split(key)

    # Small NCHW shapes consistent with the module's usage inside SGN.
    x = jax.random.normal(kx, (2, 4, 16, 16), dtype=jnp.float32)
    y = jax.random.normal(ky, (2, 6, 16, 16), dtype=jnp.float32)

    out = concate(x, y)          # flat, lane-aligned path (D1 = 1024)
    jax.block_until_ready(out)
    ref = jnp.concatenate((x, y), axis=1)
    assert out.shape == ref.shape, (out.shape, ref.shape)
    assert jnp.array_equal(out, ref), "mismatch vs jnp.concatenate reference"

    # Also exercise the non-128-aligned fallback path.
    x2 = jax.random.normal(kx, (2, 3, 10, 10), dtype=jnp.float32)
    y2 = jax.random.normal(ky, (2, 5, 10, 10), dtype=jnp.float32)
    out2 = concate(x2, y2)
    jax.block_until_ready(out2)
    ref2 = jnp.concatenate((x2, y2), axis=1)
    assert out2.shape == ref2.shape, (out2.shape, ref2.shape)
    assert jnp.array_equal(out2, ref2), "mismatch on fallback path"

    print("KERNEL_OK")
</pallas_src>

<mosaic_0001>
module attributes {stable_mosaic.version = 11 : i64} {
  func.func @_concat_flat_kernel(%arg0: i32, %arg1: memref<2x1024xf32, #tpu.memory_space<vmem>>, %arg2: memref<2x1536xf32, #tpu.memory_space<vmem>>, %arg3: memref<2x2560xf32, #tpu.memory_space<vmem>>) attributes {dimension_semantics = [#tpu.dimension_semantics<parallel>], iteration_bounds = array<i64: 1>, scalar_prefetch = 0 : i64, scratch_operands = 0 : i64, tpu.core_type = #tpu.core_type<tc>, window_params = [{transform_indices = @transform_0, window_bounds = array<i64: 2, 1024>}, {transform_indices = @transform_1, window_bounds = array<i64: 2, 1536>}, {transform_indices = @transform_2, window_bounds = array<i64: 2, 2560>}]} {
    %c0 = arith.constant 0 : index
    %c0_0 = arith.constant 0 : index
    %0 = vector.load %arg1[%c0, %c0_0] : memref<2x1024xf32, #tpu.memory_space<vmem>>, vector<2x1024xf32>
    %c0_1 = arith.constant 0 : index
    %c0_2 = arith.constant 0 : index
    %1 = vector.load %arg3[%c0_1, %c0_2] : memref<2x2560xf32, #tpu.memory_space<vmem>>, vector<2x1024xf32>
    tpu.vector_store %arg3[%c0_1, %c0_2], %0 {strides = array<i32>} : memref<2x2560xf32, #tpu.memory_space<vmem>>, vector<2x1024xf32>,
    %c0_3 = arith.constant 0 : index
    %c0_4 = arith.constant 0 : index
    %2 = vector.load %arg2[%c0_3, %c0_4] : memref<2x1536xf32, #tpu.memory_space<vmem>>, vector<2x1536xf32>
    %c0_5 = arith.constant 0 : index
    %c1024 = arith.constant 1024 : index
    %3 = vector.load %arg3[%c0_5, %c1024] : memref<2x2560xf32, #tpu.memory_space<vmem>>, vector<2x1536xf32>
    tpu.vector_store %arg3[%c0_5, %c1024], %2 {strides = array<i32>} : memref<2x2560xf32, #tpu.memory_space<vmem>>, vector<2x1536xf32>,
    return
  }
  func.func @transform_0(%arg0: i32) -> (i32, i32) {
    %c0_i32 = arith.constant 0 : i32
    %c0_i32_0 = arith.constant 0 : i32
    return %arg0, %c0_i32 : i32, i32
  }
  func.func @transform_1(%arg0: i32) -> (i32, i32) {
    %c0_i32 = arith.constant 0 : i32
    %c0_i32_0 = arith.constant 0 : i32
    return %arg0, %c0_i32 : i32, i32
  }
  func.func @transform_2(%arg0: i32) -> (i32, i32) {
    %c0_i32 = arith.constant 0 : i32
    %c0_i32_0 = arith.constant 0 : i32
    return %arg0, %c0_i32 : i32, i32
  }
}

</mosaic_0001>

<bundles_post_ra>
// kernel: tpu_custom_call.1
= control target key start
LH: loop header
LB: loop body
LE: loop exit
PB: predicated region body
PF: predicated region fallthrough
CT: control target
= control target key end

     0   :  { %7 = vsyncpa [#allocation3], 0  ;;  %s158_s0 = inlined_call_operand.hbm [shape: f32[2,1024], index: 0, kind: input, shape index: {}]   ;;  %s159_s1 = inlined_call_operand.hbm [shape: f32[2,1536], index: 1, kind: input, shape index: {}]   ;;  %s160_s2 = inlined_call_operand.hbm [shape: f32[2,2560], index: 2, kind: output, shape index: {}]  }
   0x1   :  { %8 = vsyncpa [#allocation6], 0 }
   0x2   :  { %9 = vsyncpa [#allocation4], 0  ;;  %s131_s9 = smov [#allocation2]   ;;  %s132_s11 = smov [#allocation5]  }
   0x3   :  { %s16_s10 = sshll.u32 %s131_s9, 4  ;;  %s26_s12 = sshll.u32 %s132_s11, 4  ;;  %s17_s10 = int_to_ptr.vmem [resolvable:$true] %s16_s10  ;;  %s27_s12 = int_to_ptr.vmem [resolvable:$true] %s26_s12 }
   0x4   :  { %s73_s13 = scalar_lea.vmem %s17_s10, 256  ;;  %p78_p1 = scmp.lt.s32.totalorder %s17_s10, %s17_s10 }
   0x5   :  { %p74_p0 = scmp.ne.s32.totalorder %s17_s10, %s73_s13  ;;  %p79_p2 = scmp.lt.s32.totalorder %s73_s13, %s73_s13 }
   0x7   :  { %p80_p3 = por %p79_p2, %p78_p1 }
   0x9   :  { %p81_p4 = pnand %p80_p3, %p74_p0 }
   0xb   :  { %84 = shalt.err (!%p81_p4)
}
   0xc   :  { %19 = dma.hbm_to_vmem [thread:$0]  %s158_s0, 256, %s17_s10, [#allocation3]  }
   0xd   :  { %s93_s16 = scalar_lea.vmem %s27_s12, 384  ;;  %p98_p6 = scmp.lt.s32.totalorder %s27_s12, %s27_s12 }
   0xe   :  { %p94_p5 = scmp.ne.s32.totalorder %s27_s12, %s93_s16  ;;  %p99_p7 = scmp.lt.s32.totalorder %s93_s16, %s93_s16 }
  0x10   :  { %p100_p8 = por %p99_p7, %p98_p6 }
  0x12   :  { %p101_p9 = pnand %p100_p8, %p94_p5 }
  0x14   :  { %104 = shalt.err (!%p101_p9)
}
  0x15   :  { %29 = dma.hbm_to_vmem [thread:$0]  %s159_s1, 384, %s27_s12, [#allocation6]  }
  0x16   :  { %125 = dma.done.wait [#allocation3], 256  }
  0x17   :  { %126 = vsyncadd [#allocation3], 4294967040 }
  0x18   :  { %127 = dma.done.wait [#allocation6], 384  }
  0x19   :  { %128 = vsyncadd [#allocation6], 4294966912  ;;  %s133_s19 = smov [#allocation7]   ;;  %v36_v0 = vld [vmem:[#allocation2] sm:$0xff]  ;;  %v37_v1 = vld [vmem:[#allocation2 + $0x8] sm:$0xff] }
  0x1a   :  { %s52_s20 = sshll.u32 %s133_s19, 4  ;;  %v40_v2 = vld [vmem:[#allocation5] sm:$0xff]  ;;  %38 = vst [vmem:[#allocation7] sm:$0xff] %v36_v0  ;;  %39 = vst [vmem:[#allocation7 + $0x8] sm:$0xff] %v37_v1  ;;  %v41_v3 = vld [vmem:[#allocation5 + $0x8] sm:$0xff]  ;;  %s53_s20 = int_to_ptr.vmem [resolvable:$true] %s52_s20 }
  0x1b   :  { %43 = vst [vmem:[#allocation7 + $0x10] sm:$0xff] %v40_v2  ;;  %v42_v4 = vld [vmem:[#allocation5 + $0x10] sm:$0xff]  ;;  %44 = vst [vmem:[#allocation7 + $0x18] sm:$0xff] %v41_v3  ;;  %s105_s0 = scalar_lea.vmem %s53_s20, 640  ;;  %p110_p11 = scmp.lt.s32.totalorder %s53_s20, %s53_s20 }
  0x1c   :  { %45 = vst [vmem:[#allocation7 + $0x20] sm:$0xff] %v42_v4  ;;  %p106_p10 = scmp.ne.s32.totalorder %s53_s20, %s105_s0  ;;  %p111_p12 = scmp.lt.s32.totalorder %s105_s0, %s105_s0 }
  0x1e   :  { %p112_p13 = por %p111_p12, %p110_p11 }
  0x20   :  { %p113_p0 = pnand %p112_p13, %p106_p10 }
  0x22   :  { %116 = shalt.err (!%p113_p0)
}
  0x23   :  { %55 = dma.vmem_to_hbm [thread:$0]  %s53_s20, 640, %s160_s2, [#allocation4]  }
  0x24   :  { %129 = dma.done.wait [#allocation4], 640  }
  0x25   :  { %130 = vsyncadd [#allocation4], 4294966656 }
  0x26   :  { %59 = vsyncpa [#allocation3], 1 }
  0x27   :  { %60 = vsyncpa [#allocation6], 1 }
  0x28   :  { %61 = vsyncpa [#allocation4], 1 }

</bundles_post_ra>
